<compile_context>
chip_gen: v5e
topology: v5e:2x2
jax: 0.10.0
libtpu: 0.0.40
codegen_flags: <defaults>
</compile_context>

<pallas_src>
import functools
import math

import jax
import jax.numpy as jnp
from jax import lax
from jax.experimental import pallas as pl
from jax.experimental.pallas import tpu as pltpu


def downsample_kernel(x_ref, m_ref, wt1_ref, bt1_ref, wt2_ref, bt2_ref,
                      wpr_ref, bpr_ref, wdw_ref, bdw_ref, wdn_ref, bdn_ref,
                      o_ref, *, c_in, oup, init, w2):
    L = x_ref.shape[3]                       # bb * h2 * w2 (lane axis)

    # ---- hoisted boundary masks (0/1 floats, computed once on the host) ----
    masks = m_ref[...]                       # (4, L)
    row_m = {-1: masks[0:1, :], 1: masks[1:2, :]}
    col_m = {-1: masks[2:3, :], 1: masks[3:4, :]}

    def shift(t, dh, dw):
        """out[..., q] = t[..., q + dh*w2 + dw] within each image, zero-padded."""
        s = dh * w2 + dw
        out = t if s == 0 else pltpu.roll(t, (-s) % L, 1)
        if dh != 0:
            out = out * row_m[dh]
        if dw != 0:
            out = out * col_m[dw]
        return out

    # ---- nn.MaxPool2d(2): reduce over the 4 gathered window slabs ----------
    xp = jnp.maximum(jnp.maximum(x_ref[0, 0], x_ref[0, 1]),
                     jnp.maximum(x_ref[0, 2], x_ref[0, 3]))      # (c_in, L)

    # ---- branch_top stage 1: Conv2d(3,1), padding (1,0) ---------------------
    wt1 = wt1_ref[...]                       # (oup, c_in*3)
    acc = jnp.zeros((oup, L), jnp.float32)
    for kh in range(3):
        xs = shift(xp, kh - 1, 0)            # one shifted tile live at a time
        for c in range(c_in):
            k = c * 3 + kh
            acc = acc + wt1[:, k:k + 1] * xs[c:c + 1, :]
    t = acc + bt1_ref[...]                   # (oup, L)

    # ---- branch_top stage 2: Conv2d(1,3), padding (0,1); MaxPool2d(1)=id ----
    wt2 = wt2_ref[...]                       # (oup, oup*3)
    acc = jnp.zeros((oup, L), jnp.float32)
    for kw in range(3):
        ts = shift(t, 0, kw - 1)
        for c in range(oup):
            k = c * 3 + kw
            acc = acc + wt2[:, k:k + 1] * ts[c:c + 1, :]
    top = acc + bt2_ref[...]

    # ---- branch_middle: GhostModule (BN folded, inference mode) -------------
    wpr = wpr_ref[...]                       # (init, c_in)
    acc = jnp.zeros((init, L), jnp.float32)
    for c in range(c_in):
        acc = acc + wpr[:, c:c + 1] * xp[c:c + 1, :]
    x1 = jnp.maximum(acc + bpr_ref[...], 0.0)        # primary 1x1 + BN + ReLU

    wdw = wdw_ref[...]                       # (init, 9) depthwise taps
    acc = jnp.zeros((init, L), jnp.float32)
    for kh in range(3):
        for kw in range(3):
            k = kh * 3 + kw
            acc = acc + wdw[:, k:k + 1] * shift(x1, kh - 1, kw - 1)
    x2 = jnp.maximum(acc + bdw_ref[...], 0.0)        # cheap dw 3x3 + BN + ReLU
    ghost = jnp.concatenate([x1, x2], axis=0)[:oup]  # cat + slice to oup

    # ---- branch_down: 1x1 conv + bias (MaxPool2d(1) identity) ---------------
    wdn = wdn_ref[...]                       # (oup, c_in)
    acc = jnp.zeros((oup, L), jnp.float32)
    for c in range(c_in):
        acc = acc + wdn[:, c:c + 1] * xp[c:c + 1, :]
    down = acc + bdn_ref[...]

    # ---- 3-branch sum: single dense (oup, L) store --------------------------
    o_ref[0, :, :] = top + ghost + down


def downsample_block(x, p):
    n, c_in, h, w = x.shape
    assert h % 2 == 0 and w % 2 == 0, "MaxPool2d(2) requires even H and W"
    oup = p['wt1'].shape[0]
    init = p['wpr'].shape[0]
    h2, w2 = h // 2, w // 2
    S = h2 * w2

    # Pack bb images onto the lane axis so tiles are lane-dense (target 128).
    bb = min(n, max(1, 128 // S))
    nb = (n + bb - 1) // bb
    n_pad = nb * bb
    if n_pad != n:
        x = jnp.pad(x, ((0, n_pad - n), (0, 0), (0, 0), (0, 0)))
    L = bb * S

    # Gather 2x2 pooling windows into a leading window dim and flatten
    # (batch-in-block, h2, w2) onto lanes.  Pure data-movement glue.
    # TODO(synk): at large image sizes this host-side gather should be fused
    # in-kernel, but the stride-2 column split has no clean lane-dense Pallas
    # equivalent (cross-lane relayout), so it stays in the wrapper here.
    xw = (x.reshape(nb, bb, c_in, h2, 2, w2, 2)
           .transpose(0, 4, 6, 2, 1, 3, 5)
           .reshape(nb, 4, c_in, L))

    # Host-precomputed boundary masks (valid-position indicators per lane).
    lane = jnp.arange(L, dtype=jnp.int32)
    ii = (lane % S) // w2
    jj = lane % w2
    bmask = jnp.stack([ii >= 1,          # dh = -1 valid
                       ii + 1 < h2,      # dh = +1 valid
                       jj >= 1,          # dw = -1 valid
                       jj + 1 < w2],     # dw = +1 valid
                      axis=0).astype(jnp.float32)          # (4, L)

    # Weights as small VMEM tiles: output channel on sublane, taps on lane.
    col = lambda b: b.reshape(-1, 1)
    params = [bmask,
              p['wt1'].reshape(oup, c_in * 3), col(p['bt1']),
              p['wt2'].reshape(oup, oup * 3), col(p['bt2']),
              p['wpr'].reshape(init, c_in), col(p['bpr']),
              p['wdw'].reshape(init, 9), col(p['bdw']),
              p['wdn'].reshape(oup, c_in), col(p['bdn'])]

    def full_spec(a):
        nd = a.ndim
        return pl.BlockSpec(a.shape, lambda g: (0,) * nd)

    kern = functools.partial(downsample_kernel, c_in=c_in, oup=oup,
                             init=init, w2=w2)

    out = pl.pallas_call(
        kern,
        out_shape=jax.ShapeDtypeStruct((nb, oup, L), jnp.float32),
        grid=(nb,),
        in_specs=[pl.BlockSpec((1, 4, c_in, L), lambda g: (g, 0, 0, 0))]
                 + [full_spec(a) for a in params],
        out_specs=pl.BlockSpec((1, oup, L), lambda g: (g, 0, 0)),
        compiler_params=pltpu.CompilerParams(
            dimension_semantics=("parallel",)),
    )(xw, *params)

    out = (out.reshape(nb, oup, bb, h2, w2)
              .transpose(0, 2, 1, 3, 4)
              .reshape(n_pad, oup, h2, w2))
    return out[:n]


def make_params(key, c_in, oup):
    """Deterministic synthetic params; BatchNorm (inference) folded into convs."""
    init = math.ceil(oup / 2)
    ks = jax.random.split(key, 16)
    rnd = lambda k, s: 0.1 * jax.random.normal(k, s, jnp.float32)
    p = {}
    p['wt1'] = rnd(ks[0], (oup, c_in, 3, 1))
    p['bt1'] = rnd(ks[1], (oup,))
    p['wt2'] = rnd(ks[2], (oup, oup, 1, 3))
    p['bt2'] = rnd(ks[3], (oup,))
    # Ghost primary: Conv(no bias) + BN + ReLU  -> fold BN
    w_pr = rnd(ks[4], (init, c_in, 1, 1))
    g_pr, b_pr = 1.0 + rnd(ks[5], (init,)), rnd(ks[6], (init,))
    m_pr = rnd(ks[7], (init,))
    v_pr = 0.5 + jax.random.uniform(ks[8], (init,), jnp.float32)
    s_pr = g_pr / jnp.sqrt(v_pr + 1e-5)
    p['wpr'] = w_pr * s_pr[:, None, None, None]
    p['bpr'] = b_pr - m_pr * s_pr
    # Ghost cheap: depthwise Conv(no bias) + BN + ReLU  -> fold BN
    w_dw = rnd(ks[9], (init, 1, 3, 3))
    g_dw, b_dw = 1.0 + rnd(ks[10], (init,)), rnd(ks[11], (init,))
    m_dw = rnd(ks[12], (init,))
    v_dw = 0.5 + jax.random.uniform(ks[13], (init,), jnp.float32)
    s_dw = g_dw / jnp.sqrt(v_dw + 1e-5)
    p['wdw'] = w_dw * s_dw[:, None, None, None]
    p['bdw'] = b_dw - m_dw * s_dw
    p['wdn'] = rnd(ks[14], (oup, c_in, 1, 1))
    p['bdn'] = rnd(ks[15], (oup,))
    return p
    # TODO(synk): BatchNorm is implemented in inference mode (running stats);
    # PyTorch training-mode batch statistics are not reproduced.


def downsample_block_ref(x, p):
    """Pure-JAX reference (same folded-BN parameters) for verification."""
    dn = ('NCHW', 'OIHW', 'NCHW')
    oup, init = p['wt1'].shape[0], p['wpr'].shape[0]
    xp = lax.reduce_window(x, -jnp.inf, lax.max, (1, 1, 2, 2), (1, 1, 2, 2), 'VALID')
    t = lax.conv_general_dilated(xp, p['wt1'], (1, 1), ((1, 1), (0, 0)),
                                 dimension_numbers=dn) + p['bt1'][None, :, None, None]
    top = lax.conv_general_dilated(t, p['wt2'], (1, 1), ((0, 0), (1, 1)),
                                   dimension_numbers=dn) + p['bt2'][None, :, None, None]
    x1 = lax.conv_general_dilated(xp, p['wpr'], (1, 1), ((0, 0), (0, 0)),
                                  dimension_numbers=dn) + p['bpr'][None, :, None, None]
    x1 = jnp.maximum(x1, 0.0)
    x2 = lax.conv_general_dilated(x1, p['wdw'], (1, 1), ((1, 1), (1, 1)),
                                  dimension_numbers=dn,
                                  feature_group_count=init) + p['bdw'][None, :, None, None]
    x2 = jnp.maximum(x2, 0.0)
    ghost = jnp.concatenate([x1, x2], axis=1)[:, :oup]
    down = lax.conv_general_dilated(xp, p['wdn'], (1, 1), ((0, 0), (0, 0)),
                                    dimension_numbers=dn) + p['bdn'][None, :, None, None]
    return top + ghost + down


if __name__ == "__main__":
    key = jax.random.PRNGKey(0)
    kx, kp = jax.random.split(key)
    N, C_IN, H, W = 2, 4, 16, 16
    OUP = 8
    x = jax.random.normal(kx, (N, C_IN, H, W), jnp.float32)
    params = make_params(kp, C_IN, OUP)

    out = jax.block_until_ready(downsample_block(x, params))
    assert out.shape == (N, OUP, H // 2, W // 2), out.shape

    ref = downsample_block_ref(x, params)
    if not bool(jnp.allclose(out, ref, atol=1e-3, rtol=1e-3)):
        raise AssertionError(
            f"mismatch vs reference, max abs diff = {float(jnp.max(jnp.abs(out - ref)))}")
    print("KERNEL_OK")
</pallas_src>

<mosaic_0001>
module attributes {stable_mosaic.version = 11 : i64} {
  func.func @downsample_kernel(%arg0: i32, %arg1: memref<1x4x4x128xf32, #tpu.memory_space<vmem>>, %arg2: memref<4x128xf32, #tpu.memory_space<vmem>>, %arg3: memref<8x12xf32, #tpu.memory_space<vmem>>, %arg4: memref<8x1xf32, #tpu.memory_space<vmem>>, %arg5: memref<8x24xf32, #tpu.memory_space<vmem>>, %arg6: memref<8x1xf32, #tpu.memory_space<vmem>>, %arg7: memref<4x4xf32, #tpu.memory_space<vmem>>, %arg8: memref<4x1xf32, #tpu.memory_space<vmem>>, %arg9: memref<4x9xf32, #tpu.memory_space<vmem>>, %arg10: memref<4x1xf32, #tpu.memory_space<vmem>>, %arg11: memref<8x4xf32, #tpu.memory_space<vmem>>, %arg12: memref<8x1xf32, #tpu.memory_space<vmem>>, %arg13: memref<1x8x128xf32, #tpu.memory_space<vmem>>) attributes {dimension_semantics = [#tpu.dimension_semantics<parallel>], iteration_bounds = array<i64: 1>, scalar_prefetch = 0 : i64, scratch_operands = 0 : i64, tpu.core_type = #tpu.core_type<tc>, window_params = [{transform_indices = @transform_0, window_bounds = array<i64: 1, 4, 4, 128>}, {pipeline_mode = #tpu.pipeline_mode<synchronous>, transform_indices = @transform_1, window_bounds = array<i64: 4, 128>}, {pipeline_mode = #tpu.pipeline_mode<synchronous>, transform_indices = @transform_2, window_bounds = array<i64: 8, 12>}, {pipeline_mode = #tpu.pipeline_mode<synchronous>, transform_indices = @transform_3, window_bounds = array<i64: 8, 1>}, {pipeline_mode = #tpu.pipeline_mode<synchronous>, transform_indices = @transform_4, window_bounds = array<i64: 8, 24>}, {pipeline_mode = #tpu.pipeline_mode<synchronous>, transform_indices = @transform_5, window_bounds = array<i64: 8, 1>}, {pipeline_mode = #tpu.pipeline_mode<synchronous>, transform_indices = @transform_6, window_bounds = array<i64: 4, 4>}, {pipeline_mode = #tpu.pipeline_mode<synchronous>, transform_indices = @transform_7, window_bounds = array<i64: 4, 1>}, {pipeline_mode = #tpu.pipeline_mode<synchronous>, transform_indices = @transform_8, window_bounds = array<i64: 4, 9>}, {pipeline_mode = #tpu.pipeline_mode<synchronous>, transform_indices = @transform_9, window_bounds = array<i64: 4, 1>}, {pipeline_mode = #tpu.pipeline_mode<synchronous>, transform_indices = @transform_10, window_bounds = array<i64: 8, 4>}, {pipeline_mode = #tpu.pipeline_mode<synchronous>, transform_indices = @transform_11, window_bounds = array<i64: 8, 1>}, {transform_indices = @transform_12, window_bounds = array<i64: 1, 8, 128>}]} {
    %c0 = arith.constant 0 : index
    %c0_0 = arith.constant 0 : index
    %0 = vector.load %arg2[%c0, %c0_0] : memref<4x128xf32, #tpu.memory_space<vmem>>, vector<4x128xf32>
    %1 = vector.extract_strided_slice %0 {offsets = [0, 0], sizes = [1, 128], strides = [1, 1]} : vector<4x128xf32> to vector<1x128xf32>
    %2 = vector.extract_strided_slice %0 {offsets = [1, 0], sizes = [1, 128], strides = [1, 1]} : vector<4x128xf32> to vector<1x128xf32>
    %3 = vector.extract_strided_slice %0 {offsets = [2, 0], sizes = [1, 128], strides = [1, 1]} : vector<4x128xf32> to vector<1x128xf32>
    %4 = vector.extract_strided_slice %0 {offsets = [3, 0], sizes = [1, 128], strides = [1, 1]} : vector<4x128xf32> to vector<1x128xf32>
    %c0_1 = arith.constant 0 : index
    %c0_2 = arith.constant 0 : index
    %c0_3 = arith.constant 0 : index
    %c0_4 = arith.constant 0 : index
    %5 = vector.load %arg1[%c0_1, %c0_2, %c0_3, %c0_4] : memref<1x4x4x128xf32, #tpu.memory_space<vmem>>, vector<1x1x4x128xf32>
    %6 = vector.shape_cast %5 : vector<1x1x4x128xf32> to vector<4x128xf32>
    %c0_5 = arith.constant 0 : index
    %c1 = arith.constant 1 : index
    %c0_6 = arith.constant 0 : index
    %c0_7 = arith.constant 0 : index
    %7 = vector.load %arg1[%c0_5, %c1, %c0_6, %c0_7] : memref<1x4x4x128xf32, #tpu.memory_space<vmem>>, vector<1x1x4x128xf32>
    %8 = vector.shape_cast %7 : vector<1x1x4x128xf32> to vector<4x128xf32>
    %9 = arith.maximumf %6, %8 : vector<4x128xf32>
    %c0_8 = arith.constant 0 : index
    %c2 = arith.constant 2 : index
    %c0_9 = arith.constant 0 : index
    %c0_10 = arith.constant 0 : index
    %10 = vector.load %arg1[%c0_8, %c2, %c0_9, %c0_10] : memref<1x4x4x128xf32, #tpu.memory_space<vmem>>, vector<1x1x4x128xf32>
    %11 = vector.shape_cast %10 : vector<1x1x4x128xf32> to vector<4x128xf32>
    %c0_11 = arith.constant 0 : index
    %c3 = arith.constant 3 : index
    %c0_12 = arith.constant 0 : index
    %c0_13 = arith.constant 0 : index
    %12 = vector.load %arg1[%c0_11, %c3, %c0_12, %c0_13] : memref<1x4x4x128xf32, #tpu.memory_space<vmem>>, vector<1x1x4x128xf32>
    %13 = vector.shape_cast %12 : vector<1x1x4x128xf32> to vector<4x128xf32>
    %14 = arith.maximumf %11, %13 : vector<4x128xf32>
    %15 = arith.maximumf %9, %14 : vector<4x128xf32>
    %c0_14 = arith.constant 0 : index
    %c0_15 = arith.constant 0 : index
    %16 = vector.load %arg3[%c0_14, %c0_15] : memref<8x12xf32, #tpu.memory_space<vmem>>, vector<8x12xf32>
    %cst = arith.constant 0.000000e+00 : f32
    %17 = vector.broadcast %cst : f32 to vector<8x128xf32>
    %c8_i32 = arith.constant 8 : i32
    %18 = tpu.dynamic_rotate %15 by %c8_i32 dim 1 : vector<4x128xf32>, i32 -> vector<4x128xf32>
    %19 = vector.broadcast %1 : vector<1x128xf32> to vector<4x128xf32>
    %20 = arith.mulf %18, %19 : vector<4x128xf32>
    %21 = vector.extract_strided_slice %16 {offsets = [0, 0], sizes = [8, 1], strides = [1, 1]} : vector<8x12xf32> to vector<8x1xf32>
    %22 = vector.extract_strided_slice %20 {offsets = [0, 0], sizes = [1, 128], strides = [1, 1]} : vector<4x128xf32> to vector<1x128xf32>
    %23 = vector.broadcast %21 : vector<8x1xf32> to vector<8x128xf32>
    %24 = vector.broadcast %22 : vector<1x128xf32> to vector<8x128xf32>
    %25 = arith.mulf %23, %24 : vector<8x128xf32>
    %26 = arith.addf %17, %25 : vector<8x128xf32>
    %27 = vector.extract_strided_slice %16 {offsets = [0, 3], sizes = [8, 1], strides = [1, 1]} : vector<8x12xf32> to vector<8x1xf32>
    %28 = vector.extract_strided_slice %20 {offsets = [1, 0], sizes = [1, 128], strides = [1, 1]} : vector<4x128xf32> to vector<1x128xf32>
    %29 = vector.broadcast %27 : vector<8x1xf32> to vector<8x128xf32>
    %30 = vector.broadcast %28 : vector<1x128xf32> to vector<8x128xf32>
    %31 = arith.mulf %29, %30 : vector<8x128xf32>
    %32 = arith.addf %26, %31 : vector<8x128xf32>
    %33 = vector.extract_strided_slice %16 {offsets = [0, 6], sizes = [8, 1], strides = [1, 1]} : vector<8x12xf32> to vector<8x1xf32>
    %34 = vector.extract_strided_slice %20 {offsets = [2, 0], sizes = [1, 128], strides = [1, 1]} : vector<4x128xf32> to vector<1x128xf32>
    %35 = vector.broadcast %33 : vector<8x1xf32> to vector<8x128xf32>
    %36 = vector.broadcast %34 : vector<1x128xf32> to vector<8x128xf32>
    %37 = arith.mulf %35, %36 : vector<8x128xf32>
    %38 = arith.addf %32, %37 : vector<8x128xf32>
    %39 = vector.extract_strided_slice %16 {offsets = [0, 9], sizes = [8, 1], strides = [1, 1]} : vector<8x12xf32> to vector<8x1xf32>
    %40 = vector.extract_strided_slice %20 {offsets = [3, 0], sizes = [1, 128], strides = [1, 1]} : vector<4x128xf32> to vector<1x128xf32>
    %41 = vector.broadcast %39 : vector<8x1xf32> to vector<8x128xf32>
    %42 = vector.broadcast %40 : vector<1x128xf32> to vector<8x128xf32>
    %43 = arith.mulf %41, %42 : vector<8x128xf32>
    %44 = arith.addf %38, %43 : vector<8x128xf32>
    %45 = vector.extract_strided_slice %16 {offsets = [0, 1], sizes = [8, 1], strides = [1, 1]} : vector<8x12xf32> to vector<8x1xf32>
    %46 = vector.extract_strided_slice %15 {offsets = [0, 0], sizes = [1, 128], strides = [1, 1]} : vector<4x128xf32> to vector<1x128xf32>
    %47 = vector.broadcast %45 : vector<8x1xf32> to vector<8x128xf32>
    %48 = vector.broadcast %46 : vector<1x128xf32> to vector<8x128xf32>
    %49 = arith.mulf %47, %48 : vector<8x128xf32>
    %50 = arith.addf %44, %49 : vector<8x128xf32>
    %51 = vector.extract_strided_slice %16 {offsets = [0, 4], sizes = [8, 1], strides = [1, 1]} : vector<8x12xf32> to vector<8x1xf32>
    %52 = vector.extract_strided_slice %15 {offsets = [1, 0], sizes = [1, 128], strides = [1, 1]} : vector<4x128xf32> to vector<1x128xf32>
    %53 = vector.broadcast %51 : vector<8x1xf32> to vector<8x128xf32>
    %54 = vector.broadcast %52 : vector<1x128xf32> to vector<8x128xf32>
    %55 = arith.mulf %53, %54 : vector<8x128xf32>
    %56 = arith.addf %50, %55 : vector<8x128xf32>
    %57 = vector.extract_strided_slice %16 {offsets = [0, 7], sizes = [8, 1], strides = [1, 1]} : vector<8x12xf32> to vector<8x1xf32>
    %58 = vector.extract_strided_slice %15 {offsets = [2, 0], sizes = [1, 128], strides = [1, 1]} : vector<4x128xf32> to vector<1x128xf32>
    %59 = vector.broadcast %57 : vector<8x1xf32> to vector<8x128xf32>
    %60 = vector.broadcast %58 : vector<1x128xf32> to vector<8x128xf32>
    %61 = arith.mulf %59, %60 : vector<8x128xf32>
    %62 = arith.addf %56, %61 : vector<8x128xf32>
    %63 = vector.extract_strided_slice %16 {offsets = [0, 10], sizes = [8, 1], strides = [1, 1]} : vector<8x12xf32> to vector<8x1xf32>
    %64 = vector.extract_strided_slice %15 {offsets = [3, 0], sizes = [1, 128], strides = [1, 1]} : vector<4x128xf32> to vector<1x128xf32>
    %65 = vector.broadcast %63 : vector<8x1xf32> to vector<8x128xf32>
    %66 = vector.broadcast %64 : vector<1x128xf32> to vector<8x128xf32>
    %67 = arith.mulf %65, %66 : vector<8x128xf32>
    %68 = arith.addf %62, %67 : vector<8x128xf32>
    %c120_i32 = arith.constant 120 : i32
    %69 = tpu.dynamic_rotate %15 by %c120_i32 dim 1 : vector<4x128xf32>, i32 -> vector<4x128xf32>
    %70 = vector.broadcast %2 : vector<1x128xf32> to vector<4x128xf32>
    %71 = arith.mulf %69, %70 : vector<4x128xf32>
    %72 = vector.extract_strided_slice %16 {offsets = [0, 2], sizes = [8, 1], strides = [1, 1]} : vector<8x12xf32> to vector<8x1xf32>
    %73 = vector.extract_strided_slice %71 {offsets = [0, 0], sizes = [1, 128], strides = [1, 1]} : vector<4x128xf32> to vector<1x128xf32>
    %74 = vector.broadcast %72 : vector<8x1xf32> to vector<8x128xf32>
    %75 = vector.broadcast %73 : vector<1x128xf32> to vector<8x128xf32>
    %76 = arith.mulf %74, %75 : vector<8x128xf32>
    %77 = arith.addf %68, %76 : vector<8x128xf32>
    %78 = vector.extract_strided_slice %16 {offsets = [0, 5], sizes = [8, 1], strides = [1, 1]} : vector<8x12xf32> to vector<8x1xf32>
    %79 = vector.extract_strided_slice %71 {offsets = [1, 0], sizes = [1, 128], strides = [1, 1]} : vector<4x128xf32> to vector<1x128xf32>
    %80 = vector.broadcast %78 : vector<8x1xf32> to vector<8x128xf32>
    %81 = vector.broadcast %79 : vector<1x128xf32> to vector<8x128xf32>
    %82 = arith.mulf %80, %81 : vector<8x128xf32>
    %83 = arith.addf %77, %82 : vector<8x128xf32>
    %84 = vector.extract_strided_slice %16 {offsets = [0, 8], sizes = [8, 1], strides = [1, 1]} : vector<8x12xf32> to vector<8x1xf32>
    %85 = vector.extract_strided_slice %71 {offsets = [2, 0], sizes = [1, 128], strides = [1, 1]} : vector<4x128xf32> to vector<1x128xf32>
    %86 = vector.broadcast %84 : vector<8x1xf32> to vector<8x128xf32>
    %87 = vector.broadcast %85 : vector<1x128xf32> to vector<8x128xf32>
    %88 = arith.mulf %86, %87 : vector<8x128xf32>
    %89 = arith.addf %83, %88 : vector<8x128xf32>
    %90 = vector.extract_strided_slice %16 {offsets = [0, 11], sizes = [8, 1], strides = [1, 1]} : vector<8x12xf32> to vector<8x1xf32>
    %91 = vector.extract_strided_slice %71 {offsets = [3, 0], sizes = [1, 128], strides = [1, 1]} : vector<4x128xf32> to vector<1x128xf32>
    %92 = vector.broadcast %90 : vector<8x1xf32> to vector<8x128xf32>
    %93 = vector.broadcast %91 : vector<1x128xf32> to vector<8x128xf32>
    %94 = arith.mulf %92, %93 : vector<8x128xf32>
    %95 = arith.addf %89, %94 : vector<8x128xf32>
    %c0_16 = arith.constant 0 : index
    %c0_17 = arith.constant 0 : index
    %96 = vector.load %arg4[%c0_16, %c0_17] : memref<8x1xf32, #tpu.memory_space<vmem>>, vector<8x1xf32>
    %97 = vector.broadcast %96 : vector<8x1xf32> to vector<8x128xf32>
    %98 = arith.addf %95, %97 : vector<8x128xf32>
    %c0_18 = arith.constant 0 : index
    %c0_19 = arith.constant 0 : index
    %99 = vector.load %arg5[%c0_18, %c0_19] : memref<8x24xf32, #tpu.memory_space<vmem>>, vector<8x24xf32>
    %cst_20 = arith.constant 0.000000e+00 : f32
    %100 = vector.broadcast %cst_20 : f32 to vector<8x128xf32>
    %c1_i32 = arith.constant 1 : i32
    %101 = tpu.dynamic_rotate %98 by %c1_i32 dim 1 : vector<8x128xf32>, i32 -> vector<8x128xf32>
    %102 = vector.broadcast %3 : vector<1x128xf32> to vector<8x128xf32>
    %103 = arith.mulf %101, %102 : vector<8x128xf32>
    %104 = vector.extract_strided_slice %99 {offsets = [0, 0], sizes = [8, 1], strides = [1, 1]} : vector<8x24xf32> to vector<8x1xf32>
    %105 = vector.extract_strided_slice %103 {offsets = [0, 0], sizes = [1, 128], strides = [1, 1]} : vector<8x128xf32> to vector<1x128xf32>
    %106 = vector.broadcast %104 : vector<8x1xf32> to vector<8x128xf32>
    %107 = vector.broadcast %105 : vector<1x128xf32> to vector<8x128xf32>
    %108 = arith.mulf %106, %107 : vector<8x128xf32>
    %109 = arith.addf %100, %108 : vector<8x128xf32>
    %110 = vector.extract_strided_slice %99 {offsets = [0, 3], sizes = [8, 1], strides = [1, 1]} : vector<8x24xf32> to vector<8x1xf32>
    %111 = vector.extract_strided_slice %103 {offsets = [1, 0], sizes = [1, 128], strides = [1, 1]} : vector<8x128xf32> to vector<1x128xf32>
    %112 = vector.broadcast %110 : vector<8x1xf32> to vector<8x128xf32>
    %113 = vector.broadcast %111 : vector<1x128xf32> to vector<8x128xf32>
    %114 = arith.mulf %112, %113 : vector<8x128xf32>
    %115 = arith.addf %109, %114 : vector<8x128xf32>
    %116 = vector.extract_strided_slice %99 {offsets = [0, 6], sizes = [8, 1], strides = [1, 1]} : vector<8x24xf32> to vector<8x1xf32>
    %117 = vector.extract_strided_slice %103 {offsets = [2, 0], sizes = [1, 128], strides = [1, 1]} : vector<8x128xf32> to vector<1x128xf32>
    %118 = vector.broadcast %116 : vector<8x1xf32> to vector<8x128xf32>
    %119 = vector.broadcast %117 : vector<1x128xf32> to vector<8x128xf32>
    %120 = arith.mulf %118, %119 : vector<8x128xf32>
    %121 = arith.addf %115, %120 : vector<8x128xf32>
    %122 = vector.extract_strided_slice %99 {offsets = [0, 9], sizes = [8, 1], strides = [1, 1]} : vector<8x24xf32> to vector<8x1xf32>
    %123 = vector.extract_strided_slice %103 {offsets = [3, 0], sizes = [1, 128], strides = [1, 1]} : vector<8x128xf32> to vector<1x128xf32>
    %124 = vector.broadcast %122 : vector<8x1xf32> to vector<8x128xf32>
    %125 = vector.broadcast %123 : vector<1x128xf32> to vector<8x128xf32>
    %126 = arith.mulf %124, %125 : vector<8x128xf32>
    %127 = arith.addf %121, %126 : vector<8x128xf32>
    %128 = vector.extract_strided_slice %99 {offsets = [0, 12], sizes = [8, 1], strides = [1, 1]} : vector<8x24xf32> to vector<8x1xf32>
    %129 = vector.extract_strided_slice %103 {offsets = [4, 0], sizes = [1, 128], strides = [1, 1]} : vector<8x128xf32> to vector<1x128xf32>
    %130 = vector.broadcast %128 : vector<8x1xf32> to vector<8x128xf32>
    %131 = vector.broadcast %129 : vector<1x128xf32> to vector<8x128xf32>
    %132 = arith.mulf %130, %131 : vector<8x128xf32>
    %133 = arith.addf %127, %132 : vector<8x128xf32>
    %134 = vector.extract_strided_slice %99 {offsets = [0, 15], sizes = [8, 1], strides = [1, 1]} : vector<8x24xf32> to vector<8x1xf32>
    %135 = vector.extract_strided_slice %103 {offsets = [5, 0], sizes = [1, 128], strides = [1, 1]} : vector<8x128xf32> to vector<1x128xf32>
    %136 = vector.broadcast %134 : vector<8x1xf32> to vector<8x128xf32>
    %137 = vector.broadcast %135 : vector<1x128xf32> to vector<8x128xf32>
    %138 = arith.mulf %136, %137 : vector<8x128xf32>
    %139 = arith.addf %133, %138 : vector<8x128xf32>
    %140 = vector.extract_strided_slice %99 {offsets = [0, 18], sizes = [8, 1], strides = [1, 1]} : vector<8x24xf32> to vector<8x1xf32>
    %141 = vector.extract_strided_slice %103 {offsets = [6, 0], sizes = [1, 128], strides = [1, 1]} : vector<8x128xf32> to vector<1x128xf32>
    %142 = vector.broadcast %140 : vector<8x1xf32> to vector<8x128xf32>
    %143 = vector.broadcast %141 : vector<1x128xf32> to vector<8x128xf32>
    %144 = arith.mulf %142, %143 : vector<8x128xf32>
    %145 = arith.addf %139, %144 : vector<8x128xf32>
    %146 = vector.extract_strided_slice %99 {offsets = [0, 21], sizes = [8, 1], strides = [1, 1]} : vector<8x24xf32> to vector<8x1xf32>
    %147 = vector.extract_strided_slice %103 {offsets = [7, 0], sizes = [1, 128], strides = [1, 1]} : vector<8x128xf32> to vector<1x128xf32>
    %148 = vector.broadcast %146 : vector<8x1xf32> to vector<8x128xf32>
    %149 = vector.broadcast %147 : vector<1x128xf32> to vector<8x128xf32>
    %150 = arith.mulf %148, %149 : vector<8x128xf32>
    %151 = arith.addf %145, %150 : vector<8x128xf32>
    %152 = vector.extract_strided_slice %99 {offsets = [0, 1], sizes = [8, 1], strides = [1, 1]} : vector<8x24xf32> to vector<8x1xf32>
    %153 = vector.extract_strided_slice %98 {offsets = [0, 0], sizes = [1, 128], strides = [1, 1]} : vector<8x128xf32> to vector<1x128xf32>
    %154 = vector.broadcast %152 : vector<8x1xf32> to vector<8x128xf32>
    %155 = vector.broadcast %153 : vector<1x128xf32> to vector<8x128xf32>
    %156 = arith.mulf %154, %155 : vector<8x128xf32>
    %157 = arith.addf %151, %156 : vector<8x128xf32>
    %158 = vector.extract_strided_slice %99 {offsets = [0, 4], sizes = [8, 1], strides = [1, 1]} : vector<8x24xf32> to vector<8x1xf32>
    %159 = vector.extract_strided_slice %98 {offsets = [1, 0], sizes = [1, 128], strides = [1, 1]} : vector<8x128xf32> to vector<1x128xf32>
    %160 = vector.broadcast %158 : vector<8x1xf32> to vector<8x128xf32>
    %161 = vector.broadcast %159 : vector<1x128xf32> to vector<8x128xf32>
    %162 = arith.mulf %160, %161 : vector<8x128xf32>
    %163 = arith.addf %157, %162 : vector<8x128xf32>
    %164 = vector.extract_strided_slice %99 {offsets = [0, 7], sizes = [8, 1], strides = [1, 1]} : vector<8x24xf32> to vector<8x1xf32>
    %165 = vector.extract_strided_slice %98 {offsets = [2, 0], sizes = [1, 128], strides = [1, 1]} : vector<8x128xf32> to vector<1x128xf32>
    %166 = vector.broadcast %164 : vector<8x1xf32> to vector<8x128xf32>
    %167 = vector.broadcast %165 : vector<1x128xf32> to vector<8x128xf32>
    %168 = arith.mulf %166, %167 : vector<8x128xf32>
    %169 = arith.addf %163, %168 : vector<8x128xf32>
    %170 = vector.extract_strided_slice %99 {offsets = [0, 10], sizes = [8, 1], strides = [1, 1]} : vector<8x24xf32> to vector<8x1xf32>
    %171 = vector.extract_strided_slice %98 {offsets = [3, 0], sizes = [1, 128], strides = [1, 1]} : vector<8x128xf32> to vector<1x128xf32>
    %172 = vector.broadcast %170 : vector<8x1xf32> to vector<8x128xf32>
    %173 = vector.broadcast %171 : vector<1x128xf32> to vector<8x128xf32>
    %174 = arith.mulf %172, %173 : vector<8x128xf32>
    %175 = arith.addf %169, %174 : vector<8x128xf32>
    %176 = vector.extract_strided_slice %99 {offsets = [0, 13], sizes = [8, 1], strides = [1, 1]} : vector<8x24xf32> to vector<8x1xf32>
    %177 = vector.extract_strided_slice %98 {offsets = [4, 0], sizes = [1, 128], strides = [1, 1]} : vector<8x128xf32> to vector<1x128xf32>
    %178 = vector.broadcast %176 : vector<8x1xf32> to vector<8x128xf32>
    %179 = vector.broadcast %177 : vector<1x128xf32> to vector<8x128xf32>
    %180 = arith.mulf %178, %179 : vector<8x128xf32>
    %181 = arith.addf %175, %180 : vector<8x128xf32>
    %182 = vector.extract_strided_slice %99 {offsets = [0, 16], sizes = [8, 1], strides = [1, 1]} : vector<8x24xf32> to vector<8x1xf32>
    %183 = vector.extract_strided_slice %98 {offsets = [5, 0], sizes = [1, 128], strides = [1, 1]} : vector<8x128xf32> to vector<1x128xf32>
    %184 = vector.broadcast %182 : vector<8x1xf32> to vector<8x128xf32>
    %185 = vector.broadcast %183 : vector<1x128xf32> to vector<8x128xf32>
    %186 = arith.mulf %184, %185 : vector<8x128xf32>
    %187 = arith.addf %181, %186 : vector<8x128xf32>
    %188 = vector.extract_strided_slice %99 {offsets = [0, 19], sizes = [8, 1], strides = [1, 1]} : vector<8x24xf32> to vector<8x1xf32>
    %189 = vector.extract_strided_slice %98 {offsets = [6, 0], sizes = [1, 128], strides = [1, 1]} : vector<8x128xf32> to vector<1x128xf32>
    %190 = vector.broadcast %188 : vector<8x1xf32> to vector<8x128xf32>
    %191 = vector.broadcast %189 : vector<1x128xf32> to vector<8x128xf32>
    %192 = arith.mulf %190, %191 : vector<8x128xf32>
    %193 = arith.addf %187, %192 : vector<8x128xf32>
    %194 = vector.extract_strided_slice %99 {offsets = [0, 22], sizes = [8, 1], strides = [1, 1]} : vector<8x24xf32> to vector<8x1xf32>
    %195 = vector.extract_strided_slice %98 {offsets = [7, 0], sizes = [1, 128], strides = [1, 1]} : vector<8x128xf32> to vector<1x128xf32>
    %196 = vector.broadcast %194 : vector<8x1xf32> to vector<8x128xf32>
    %197 = vector.broadcast %195 : vector<1x128xf32> to vector<8x128xf32>
    %198 = arith.mulf %196, %197 : vector<8x128xf32>
    %199 = arith.addf %193, %198 : vector<8x128xf32>
    %c127_i32 = arith.constant 127 : i32
    %200 = tpu.dynamic_rotate %98 by %c127_i32 dim 1 : vector<8x128xf32>, i32 -> vector<8x128xf32>
    %201 = vector.broadcast %4 : vector<1x128xf32> to vector<8x128xf32>
    %202 = arith.mulf %200, %201 : vector<8x128xf32>
    %203 = vector.extract_strided_slice %99 {offsets = [0, 2], sizes = [8, 1], strides = [1, 1]} : vector<8x24xf32> to vector<8x1xf32>
    %204 = vector.extract_strided_slice %202 {offsets = [0, 0], sizes = [1, 128], strides = [1, 1]} : vector<8x128xf32> to vector<1x128xf32>
    %205 = vector.broadcast %203 : vector<8x1xf32> to vector<8x128xf32>
    %206 = vector.broadcast %204 : vector<1x128xf32> to vector<8x128xf32>
    %207 = arith.mulf %205, %206 : vector<8x128xf32>
    %208 = arith.addf %199, %207 : vector<8x128xf32>
    %209 = vector.extract_strided_slice %99 {offsets = [0, 5], sizes = [8, 1], strides = [1, 1]} : vector<8x24xf32> to vector<8x1xf32>
    %210 = vector.extract_strided_slice %202 {offsets = [1, 0], sizes = [1, 128], strides = [1, 1]} : vector<8x128xf32> to vector<1x128xf32>
    %211 = vector.broadcast %209 : vector<8x1xf32> to vector<8x128xf32>
    %212 = vector.broadcast %210 : vector<1x128xf32> to vector<8x128xf32>
    %213 = arith.mulf %211, %212 : vector<8x128xf32>
    %214 = arith.addf %208, %213 : vector<8x128xf32>
    %215 = vector.extract_strided_slice %99 {offsets = [0, 8], sizes = [8, 1], strides = [1, 1]} : vector<8x24xf32> to vector<8x1xf32>
    %216 = vector.extract_strided_slice %202 {offsets = [2, 0], sizes = [1, 128], strides = [1, 1]} : vector<8x128xf32> to vector<1x128xf32>
    %217 = vector.broadcast %215 : vector<8x1xf32> to vector<8x128xf32>
    %218 = vector.broadcast %216 : vector<1x128xf32> to vector<8x128xf32>
    %219 = arith.mulf %217, %218 : vector<8x128xf32>
    %220 = arith.addf %214, %219 : vector<8x128xf32>
    %221 = vector.extract_strided_slice %99 {offsets = [0, 11], sizes = [8, 1], strides = [1, 1]} : vector<8x24xf32> to vector<8x1xf32>
    %222 = vector.extract_strided_slice %202 {offsets = [3, 0], sizes = [1, 128], strides = [1, 1]} : vector<8x128xf32> to vector<1x128xf32>
    %223 = vector.broadcast %221 : vector<8x1xf32> to vector<8x128xf32>
    %224 = vector.broadcast %222 : vector<1x128xf32> to vector<8x128xf32>
    %225 = arith.mulf %223, %224 : vector<8x128xf32>
    %226 = arith.addf %220, %225 : vector<8x128xf32>
    %227 = vector.extract_strided_slice %99 {offsets = [0, 14], sizes = [8, 1], strides = [1, 1]} : vector<8x24xf32> to vector<8x1xf32>
    %228 = vector.extract_strided_slice %202 {offsets = [4, 0], sizes = [1, 128], strides = [1, 1]} : vector<8x128xf32> to vector<1x128xf32>
    %229 = vector.broadcast %227 : vector<8x1xf32> to vector<8x128xf32>
    %230 = vector.broadcast %228 : vector<1x128xf32> to vector<8x128xf32>
    %231 = arith.mulf %229, %230 : vector<8x128xf32>
    %232 = arith.addf %226, %231 : vector<8x128xf32>
    %233 = vector.extract_strided_slice %99 {offsets = [0, 17], sizes = [8, 1], strides = [1, 1]} : vector<8x24xf32> to vector<8x1xf32>
    %234 = vector.extract_strided_slice %202 {offsets = [5, 0], sizes = [1, 128], strides = [1, 1]} : vector<8x128xf32> to vector<1x128xf32>
    %235 = vector.broadcast %233 : vector<8x1xf32> to vector<8x128xf32>
    %236 = vector.broadcast %234 : vector<1x128xf32> to vector<8x128xf32>
    %237 = arith.mulf %235, %236 : vector<8x128xf32>
    %238 = arith.addf %232, %237 : vector<8x128xf32>
    %239 = vector.extract_strided_slice %99 {offsets = [0, 20], sizes = [8, 1], strides = [1, 1]} : vector<8x24xf32> to vector<8x1xf32>
    %240 = vector.extract_strided_slice %202 {offsets = [6, 0], sizes = [1, 128], strides = [1, 1]} : vector<8x128xf32> to vector<1x128xf32>
    %241 = vector.broadcast %239 : vector<8x1xf32> to vector<8x128xf32>
    %242 = vector.broadcast %240 : vector<1x128xf32> to vector<8x128xf32>
    %243 = arith.mulf %241, %242 : vector<8x128xf32>
    %244 = arith.addf %238, %243 : vector<8x128xf32>
    %245 = vector.extract_strided_slice %99 {offsets = [0, 23], sizes = [8, 1], strides = [1, 1]} : vector<8x24xf32> to vector<8x1xf32>
    %246 = vector.extract_strided_slice %202 {offsets = [7, 0], sizes = [1, 128], strides = [1, 1]} : vector<8x128xf32> to vector<1x128xf32>
    %247 = vector.broadcast %245 : vector<8x1xf32> to vector<8x128xf32>
    %248 = vector.broadcast %246 : vector<1x128xf32> to vector<8x128xf32>
    %249 = arith.mulf %247, %248 : vector<8x128xf32>
    %250 = arith.addf %244, %249 : vector<8x128xf32>
    %c0_21 = arith.constant 0 : index
    %c0_22 = arith.constant 0 : index
    %251 = vector.load %arg6[%c0_21, %c0_22] : memref<8x1xf32, #tpu.memory_space<vmem>>, vector<8x1xf32>
    %252 = vector.broadcast %251 : vector<8x1xf32> to vector<8x128xf32>
    %253 = arith.addf %250, %252 : vector<8x128xf32>
    %c0_23 = arith.constant 0 : index
    %c0_24 = arith.constant 0 : index
    %254 = vector.load %arg7[%c0_23, %c0_24] : memref<4x4xf32, #tpu.memory_space<vmem>>, vector<4x4xf32>
    %cst_25 = arith.constant 0.000000e+00 : f32
    %255 = vector.broadcast %cst_25 : f32 to vector<4x128xf32>
    %256 = vector.extract_strided_slice %254 {offsets = [0, 0], sizes = [4, 1], strides = [1, 1]} : vector<4x4xf32> to vector<4x1xf32>
    %257 = vector.extract_strided_slice %15 {offsets = [0, 0], sizes = [1, 128], strides = [1, 1]} : vector<4x128xf32> to vector<1x128xf32>
    %258 = vector.broadcast %256 : vector<4x1xf32> to vector<4x128xf32>
    %259 = vector.broadcast %257 : vector<1x128xf32> to vector<4x128xf32>
    %260 = arith.mulf %258, %259 : vector<4x128xf32>
    %261 = arith.addf %255, %260 : vector<4x128xf32>
    %262 = vector.extract_strided_slice %254 {offsets = [0, 1], sizes = [4, 1], strides = [1, 1]} : vector<4x4xf32> to vector<4x1xf32>
    %263 = vector.extract_strided_slice %15 {offsets = [1, 0], sizes = [1, 128], strides = [1, 1]} : vector<4x128xf32> to vector<1x128xf32>
    %264 = vector.broadcast %262 : vector<4x1xf32> to vector<4x128xf32>
    %265 = vector.broadcast %263 : vector<1x128xf32> to vector<4x128xf32>
    %266 = arith.mulf %264, %265 : vector<4x128xf32>
    %267 = arith.addf %261, %266 : vector<4x128xf32>
    %268 = vector.extract_strided_slice %254 {offsets = [0, 2], sizes = [4, 1], strides = [1, 1]} : vector<4x4xf32> to vector<4x1xf32>
    %269 = vector.extract_strided_slice %15 {offsets = [2, 0], sizes = [1, 128], strides = [1, 1]} : vector<4x128xf32> to vector<1x128xf32>
    %270 = vector.broadcast %268 : vector<4x1xf32> to vector<4x128xf32>
    %271 = vector.broadcast %269 : vector<1x128xf32> to vector<4x128xf32>
    %272 = arith.mulf %270, %271 : vector<4x128xf32>
    %273 = arith.addf %267, %272 : vector<4x128xf32>
    %274 = vector.extract_strided_slice %254 {offsets = [0, 3], sizes = [4, 1], strides = [1, 1]} : vector<4x4xf32> to vector<4x1xf32>
    %275 = vector.extract_strided_slice %15 {offsets = [3, 0], sizes = [1, 128], strides = [1, 1]} : vector<4x128xf32> to vector<1x128xf32>
    %276 = vector.broadcast %274 : vector<4x1xf32> to vector<4x128xf32>
    %277 = vector.broadcast %275 : vector<1x128xf32> to vector<4x128xf32>
    %278 = arith.mulf %276, %277 : vector<4x128xf32>
    %279 = arith.addf %273, %278 : vector<4x128xf32>
    %c0_26 = arith.constant 0 : index
    %c0_27 = arith.constant 0 : index
    %280 = vector.load %arg8[%c0_26, %c0_27] : memref<4x1xf32, #tpu.memory_space<vmem>>, vector<4x1xf32>
    %281 = vector.broadcast %280 : vector<4x1xf32> to vector<4x128xf32>
    %282 = arith.addf %279, %281 : vector<4x128xf32>
    %cst_28 = arith.constant 0.000000e+00 : f32
    %283 = vector.broadcast %cst_28 : f32 to vector<4x128xf32>
    %284 = arith.maximumf %282, %283 : vector<4x128xf32>
    %c0_29 = arith.constant 0 : index
    %c0_30 = arith.constant 0 : index
    %285 = vector.load %arg9[%c0_29, %c0_30] : memref<4x9xf32, #tpu.memory_space<vmem>>, vector<4x9xf32>
    %cst_31 = arith.constant 0.000000e+00 : f32
    %286 = vector.broadcast %cst_31 : f32 to vector<4x128xf32>
    %287 = vector.extract_strided_slice %285 {offsets = [0, 0], sizes = [4, 1], strides = [1, 1]} : vector<4x9xf32> to vector<4x1xf32>
    %c9_i32 = arith.constant 9 : i32
    %288 = tpu.dynamic_rotate %284 by %c9_i32 dim 1 : vector<4x128xf32>, i32 -> vector<4x128xf32>
    %289 = vector.broadcast %1 : vector<1x128xf32> to vector<4x128xf32>
    %290 = arith.mulf %288, %289 : vector<4x128xf32>
    %291 = vector.broadcast %3 : vector<1x128xf32> to vector<4x128xf32>
    %292 = arith.mulf %290, %291 : vector<4x128xf32>
    %293 = vector.broadcast %287 : vector<4x1xf32> to vector<4x128xf32>
    %294 = arith.mulf %293, %292 : vector<4x128xf32>
    %295 = arith.addf %286, %294 : vector<4x128xf32>
    %296 = vector.extract_strided_slice %285 {offsets = [0, 1], sizes = [4, 1], strides = [1, 1]} : vector<4x9xf32> to vector<4x1xf32>
    %c8_i32_32 = arith.constant 8 : i32
    %297 = tpu.dynamic_rotate %284 by %c8_i32_32 dim 1 : vector<4x128xf32>, i32 -> vector<4x128xf32>
    %298 = vector.broadcast %1 : vector<1x128xf32> to vector<4x128xf32>
    %299 = arith.mulf %297, %298 : vector<4x128xf32>
    %300 = vector.broadcast %296 : vector<4x1xf32> to vector<4x128xf32>
    %301 = arith.mulf %300, %299 : vector<4x128xf32>
    %302 = arith.addf %295, %301 : vector<4x128xf32>
    %303 = vector.extract_strided_slice %285 {offsets = [0, 2], sizes = [4, 1], strides = [1, 1]} : vector<4x9xf32> to vector<4x1xf32>
    %c7_i32 = arith.constant 7 : i32
    %304 = tpu.dynamic_rotate %284 by %c7_i32 dim 1 : vector<4x128xf32>, i32 -> vector<4x128xf32>
    %305 = vector.broadcast %1 : vector<1x128xf32> to vector<4x128xf32>
    %306 = arith.mulf %304, %305 : vector<4x128xf32>
    %307 = vector.broadcast %4 : vector<1x128xf32> to vector<4x128xf32>
    %308 = arith.mulf %306, %307 : vector<4x128xf32>
    %309 = vector.broadcast %303 : vector<4x1xf32> to vector<4x128xf32>
    %310 = arith.mulf %309, %308 : vector<4x128xf32>
    %311 = arith.addf %302, %310 : vector<4x128xf32>
    %312 = vector.extract_strided_slice %285 {offsets = [0, 3], sizes = [4, 1], strides = [1, 1]} : vector<4x9xf32> to vector<4x1xf32>
    %c1_i32_33 = arith.constant 1 : i32
    %313 = tpu.dynamic_rotate %284 by %c1_i32_33 dim 1 : vector<4x128xf32>, i32 -> vector<4x128xf32>
    %314 = vector.broadcast %3 : vector<1x128xf32> to vector<4x128xf32>
    %315 = arith.mulf %313, %314 : vector<4x128xf32>
    %316 = vector.broadcast %312 : vector<4x1xf32> to vector<4x128xf32>
    %317 = arith.mulf %316, %315 : vector<4x128xf32>
    %318 = arith.addf %311, %317 : vector<4x128xf32>
    %319 = vector.extract_strided_slice %285 {offsets = [0, 4], sizes = [4, 1], strides = [1, 1]} : vector<4x9xf32> to vector<4x1xf32>
    %320 = vector.broadcast %319 : vector<4x1xf32> to vector<4x128xf32>
    %321 = arith.mulf %320, %284 : vector<4x128xf32>
    %322 = arith.addf %318, %321 : vector<4x128xf32>
    %323 = vector.extract_strided_slice %285 {offsets = [0, 5], sizes = [4, 1], strides = [1, 1]} : vector<4x9xf32> to vector<4x1xf32>
    %c127_i32_34 = arith.constant 127 : i32
    %324 = tpu.dynamic_rotate %284 by %c127_i32_34 dim 1 : vector<4x128xf32>, i32 -> vector<4x128xf32>
    %325 = vector.broadcast %4 : vector<1x128xf32> to vector<4x128xf32>
    %326 = arith.mulf %324, %325 : vector<4x128xf32>
    %327 = vector.broadcast %323 : vector<4x1xf32> to vector<4x128xf32>
    %328 = arith.mulf %327, %326 : vector<4x128xf32>
    %329 = arith.addf %322, %328 : vector<4x128xf32>
    %330 = vector.extract_strided_slice %285 {offsets = [0, 6], sizes = [4, 1], strides = [1, 1]} : vector<4x9xf32> to vector<4x1xf32>
    %c121_i32 = arith.constant 121 : i32
    %331 = tpu.dynamic_rotate %284 by %c121_i32 dim 1 : vector<4x128xf32>, i32 -> vector<4x128xf32>
    %332 = vector.broadcast %2 : vector<1x128xf32> to vector<4x128xf32>
    %333 = arith.mulf %331, %332 : vector<4x128xf32>
    %334 = vector.broadcast %3 : vector<1x128xf32> to vector<4x128xf32>
    %335 = arith.mulf %333, %334 : vector<4x128xf32>
    %336 = vector.broadcast %330 : vector<4x1xf32> to vector<4x128xf32>
    %337 = arith.mulf %336, %335 : vector<4x128xf32>
    %338 = arith.addf %329, %337 : vector<4x128xf32>
    %339 = vector.extract_strided_slice %285 {offsets = [0, 7], sizes = [4, 1], strides = [1, 1]} : vector<4x9xf32> to vector<4x1xf32>
    %c120_i32_35 = arith.constant 120 : i32
    %340 = tpu.dynamic_rotate %284 by %c120_i32_35 dim 1 : vector<4x128xf32>, i32 -> vector<4x128xf32>
    %341 = vector.broadcast %2 : vector<1x128xf32> to vector<4x128xf32>
    %342 = arith.mulf %340, %341 : vector<4x128xf32>
    %343 = vector.broadcast %339 : vector<4x1xf32> to vector<4x128xf32>
    %344 = arith.mulf %343, %342 : vector<4x128xf32>
    %345 = arith.addf %338, %344 : vector<4x128xf32>
    %346 = vector.extract_strided_slice %285 {offsets = [0, 8], sizes = [4, 1], strides = [1, 1]} : vector<4x9xf32> to vector<4x1xf32>
    %c119_i32 = arith.constant 119 : i32
    %347 = tpu.dynamic_rotate %284 by %c119_i32 dim 1 : vector<4x128xf32>, i32 -> vector<4x128xf32>
    %348 = vector.broadcast %2 : vector<1x128xf32> to vector<4x128xf32>
    %349 = arith.mulf %347, %348 : vector<4x128xf32>
    %350 = vector.broadcast %4 : vector<1x128xf32> to vector<4x128xf32>
    %351 = arith.mulf %349, %350 : vector<4x128xf32>
    %352 = vector.broadcast %346 : vector<4x1xf32> to vector<4x128xf32>
    %353 = arith.mulf %352, %351 : vector<4x128xf32>
    %354 = arith.addf %345, %353 : vector<4x128xf32>
    %c0_36 = arith.constant 0 : index
    %c0_37 = arith.constant 0 : index
    %355 = vector.load %arg10[%c0_36, %c0_37] : memref<4x1xf32, #tpu.memory_space<vmem>>, vector<4x1xf32>
    %356 = vector.broadcast %355 : vector<4x1xf32> to vector<4x128xf32>
    %357 = arith.addf %354, %356 : vector<4x128xf32>
    %cst_38 = arith.constant 0.000000e+00 : f32
    %358 = vector.broadcast %cst_38 : f32 to vector<4x128xf32>
    %359 = arith.maximumf %357, %358 : vector<4x128xf32>
    %360 = tpu.concatenate %284, %359 in 0 : vector<4x128xf32>, vector<4x128xf32> -> vector<8x128xf32>
    %c0_39 = arith.constant 0 : index
    %c0_40 = arith.constant 0 : index
    %361 = vector.load %arg11[%c0_39, %c0_40] : memref<8x4xf32, #tpu.memory_space<vmem>>, vector<8x4xf32>
    %cst_41 = arith.constant 0.000000e+00 : f32
    %362 = vector.broadcast %cst_41 : f32 to vector<8x128xf32>
    %363 = vector.extract_strided_slice %361 {offsets = [0, 0], sizes = [8, 1], strides = [1, 1]} : vector<8x4xf32> to vector<8x1xf32>
    %364 = vector.extract_strided_slice %15 {offsets = [0, 0], sizes = [1, 128], strides = [1, 1]} : vector<4x128xf32> to vector<1x128xf32>
    %365 = vector.broadcast %363 : vector<8x1xf32> to vector<8x128xf32>
    %366 = vector.broadcast %364 : vector<1x128xf32> to vector<8x128xf32>
    %367 = arith.mulf %365, %366 : vector<8x128xf32>
    %368 = arith.addf %362, %367 : vector<8x128xf32>
    %369 = vector.extract_strided_slice %361 {offsets = [0, 1], sizes = [8, 1], strides = [1, 1]} : vector<8x4xf32> to vector<8x1xf32>
    %370 = vector.extract_strided_slice %15 {offsets = [1, 0], sizes = [1, 128], strides = [1, 1]} : vector<4x128xf32> to vector<1x128xf32>
    %371 = vector.broadcast %369 : vector<8x1xf32> to vector<8x128xf32>
    %372 = vector.broadcast %370 : vector<1x128xf32> to vector<8x128xf32>
    %373 = arith.mulf %371, %372 : vector<8x128xf32>
    %374 = arith.addf %368, %373 : vector<8x128xf32>
    %375 = vector.extract_strided_slice %361 {offsets = [0, 2], sizes = [8, 1], strides = [1, 1]} : vector<8x4xf32> to vector<8x1xf32>
    %376 = vector.extract_strided_slice %15 {offsets = [2, 0], sizes = [1, 128], strides = [1, 1]} : vector<4x128xf32> to vector<1x128xf32>
    %377 = vector.broadcast %375 : vector<8x1xf32> to vector<8x128xf32>
    %378 = vector.broadcast %376 : vector<1x128xf32> to vector<8x128xf32>
    %379 = arith.mulf %377, %378 : vector<8x128xf32>
    %380 = arith.addf %374, %379 : vector<8x128xf32>
    %381 = vector.extract_strided_slice %361 {offsets = [0, 3], sizes = [8, 1], strides = [1, 1]} : vector<8x4xf32> to vector<8x1xf32>
    %382 = vector.extract_strided_slice %15 {offsets = [3, 0], sizes = [1, 128], strides = [1, 1]} : vector<4x128xf32> to vector<1x128xf32>
    %383 = vector.broadcast %381 : vector<8x1xf32> to vector<8x128xf32>
    %384 = vector.broadcast %382 : vector<1x128xf32> to vector<8x128xf32>
    %385 = arith.mulf %383, %384 : vector<8x128xf32>
    %386 = arith.addf %380, %385 : vector<8x128xf32>
    %c0_42 = arith.constant 0 : index
    %c0_43 = arith.constant 0 : index
    %387 = vector.load %arg12[%c0_42, %c0_43] : memref<8x1xf32, #tpu.memory_space<vmem>>, vector<8x1xf32>
    %388 = vector.broadcast %387 : vector<8x1xf32> to vector<8x128xf32>
    %389 = arith.addf %386, %388 : vector<8x128xf32>
    %390 = arith.addf %253, %360 : vector<8x128xf32>
    %391 = arith.addf %390, %389 : vector<8x128xf32>
    %c0_44 = arith.constant 0 : index
    %c0_45 = arith.constant 0 : index
    %c0_46 = arith.constant 0 : index
    %392 = vector.load %arg13[%c0_44, %c0_45, %c0_46] : memref<1x8x128xf32, #tpu.memory_space<vmem>>, vector<1x8x128xf32>
    %393 = vector.shape_cast %392 : vector<1x8x128xf32> to vector<8x128xf32>
    %394 = vector.shape_cast %391 : vector<8x128xf32> to vector<1x8x128xf32>
    tpu.vector_store %arg13[%c0_44, %c0_45, %c0_46], %394 {strides = array<i32>} : memref<1x8x128xf32, #tpu.memory_space<vmem>>, vector<1x8x128xf32>,
    return
  }
  func.func @transform_0(%arg0: i32) -> (i32, i32, i32, i32) {
    %c0_i32 = arith.constant 0 : i32
    %c0_i32_0 = arith.constant 0 : i32
    %c0_i32_1 = arith.constant 0 : i32
    %c0_i32_2 = arith.constant 0 : i32
    return %arg0, %c0_i32, %c0_i32_0, %c0_i32_1 : i32, i32, i32, i32
  }
  func.func @transform_1(%arg0: i32) -> (i32, i32) {
    %c0_i32 = arith.constant 0 : i32
    %c0_i32_0 = arith.constant 0 : i32
    %c0_i32_1 = arith.constant 0 : i32
    return %c0_i32, %c0_i32_0 : i32, i32
  }
  func.func @transform_2(%arg0: i32) -> (i32, i32) {
    %c0_i32 = arith.constant 0 : i32
    %c0_i32_0 = arith.constant 0 : i32
    %c0_i32_1 = arith.constant 0 : i32
    return %c0_i32, %c0_i32_0 : i32, i32
  }
  func.func @transform_3(%arg0: i32) -> (i32, i32) {
    %c0_i32 = arith.constant 0 : i32
    %c0_i32_0 = arith.constant 0 : i32
    %c0_i32_1 = arith.constant 0 : i32
    return %c0_i32, %c0_i32_0 : i32, i32
  }
  func.func @transform_4(%arg0: i32) -> (i32, i32) {
    %c0_i32 = arith.constant 0 : i32
    %c0_i32_0 = arith.constant 0 : i32
    %c0_i32_1 = arith.constant 0 : i32
    return %c0_i32, %c0_i32_0 : i32, i32
  }
  func.func @transform_5(%arg0: i32) -> (i32, i32) {
    %c0_i32 = arith.constant 0 : i32
    %c0_i32_0 = arith.constant 0 : i32
    %c0_i32_1 = arith.constant 0 : i32
    return %c0_i32, %c0_i32_0 : i32, i32
  }
  func.func @transform_6(%arg0: i32) -> (i32, i32) {
    %c0_i32 = arith.constant 0 : i32
    %c0_i32_0 = arith.constant 0 : i32
    %c0_i32_1 = arith.constant 0 : i32
    return %c0_i32, %c0_i32_0 : i32, i32
  }
  func.func @transform_7(%arg0: i32) -> (i32, i32) {
    %c0_i32 = arith.constant 0 : i32
    %c0_i32_0 = arith.constant 0 : i32
    %c0_i32_1 = arith.constant 0 : i32
    return %c0_i32, %c0_i32_0 : i32, i32
  }
  func.func @transform_8(%arg0: i32) -> (i32, i32) {
    %c0_i32 = arith.constant 0 : i32
    %c0_i32_0 = arith.constant 0 : i32
    %c0_i32_1 = arith.constant 0 : i32
    return %c0_i32, %c0_i32_0 : i32, i32
  }
  func.func @transform_9(%arg0: i32) -> (i32, i32) {
    %c0_i32 = arith.constant 0 : i32
    %c0_i32_0 = arith.constant 0 : i32
    %c0_i32_1 = arith.constant 0 : i32
    return %c0_i32, %c0_i32_0 : i32, i32
  }
  func.func @transform_10(%arg0: i32) -> (i32, i32) {
    %c0_i32 = arith.constant 0 : i32
    %c0_i32_0 = arith.constant 0 : i32
    %c0_i32_1 = arith.constant 0 : i32
    return %c0_i32, %c0_i32_0 : i32, i32
  }
  func.func @transform_11(%arg0: i32) -> (i32, i32) {
    %c0_i32 = arith.constant 0 : i32
    %c0_i32_0 = arith.constant 0 : i32
    %c0_i32_1 = arith.constant 0 : i32
    return %c0_i32, %c0_i32_0 : i32, i32
  }
  func.func @transform_12(%arg0: i32) -> (i32, i32, i32) {
    %c0_i32 = arith.constant 0 : i32
    %c0_i32_0 = arith.constant 0 : i32
    %c0_i32_1 = arith.constant 0 : i32
    return %arg0, %c0_i32, %c0_i32_0 : i32, i32, i32
  }
}

</mosaic_0001>

<bundles_post_ra>
// kernel: tpu_custom_call.1
= control target key start
LH: loop header
LB: loop body
LE: loop exit
PB: predicated region body
PF: predicated region fallthrough
CT: control target
= control target key end

     0   :  { %v639_v2 = vmov 9   ;;  %v640_v3 = vmov 3   ;;  %s1037_s0 = inlined_call_operand.vmem [shape: f32[1,4,4,128], index: 0, kind: input, shape index: {}]   ;;  %s1038_s1 = inlined_call_operand.vmem [shape: f32[4,128], index: 1, kind: input, shape index: {}]   ;;  %s1039_s2 = inlined_call_operand.vmem [shape: f32[8,12], index: 2, kind: input, shape index: {}]   ;;  %s1040_s3 = inlined_call_operand.vmem [shape: f32[8,1], index: 3, kind: input, shape index: {}]   ;;  %s1041_s4 = inlined_call_operand.vmem [shape: f32[8,24], index: 4, kind: input, shape index: {}]   ;;  %s1042_s5 = inlined_call_operand.vmem [shape: f32[8,1], index: 5, kind: input, shape index: {}]   ;;  %s1043_s6 = inlined_call_operand.vmem [shape: f32[4,4], index: 6, kind: input, shape index: {}]   ;;  %s1044_s7 = inlined_call_operand.vmem [shape: f32[4,1], index: 7, kind: input, shape index: {}]   ;;  %s1045_s8 = inlined_call_operand.vmem [shape: f32[4,9], index: 8, kind: input, shape index: {}]   ;;  %s1046_s9 = inlined_call_operand.vmem [shape: f32[4,1], index: 9, kind: input, shape index: {}]   ;;  %s1047_s10 = inlined_call_operand.vmem [shape: f32[8,4], index: 10, kind: input, shape index: {}]   ;;  %s1048_s11 = inlined_call_operand.vmem [shape: f32[8,1], index: 11, kind: input, shape index: {}]   ;;  %s1049_s12 = inlined_call_operand.hbm [shape: f32[1,8,128], index: 12, kind: output, shape index: {}]  }
   0x1   :  { %v53_v0 = vld [vmem:[%s1039_s2] sm:$0xff]  ;;  %561 = vset.pattern.permute.xlu2 %v639_v2  ;;  %559 = vset.pattern.permute.xlu1 %v640_v3  ;;  %v523_v5 = vld [vmem:[%s1037_s0 + $0x8] sm:$0xf]  ;;  %v524_v6 = vld [vmem:[%s1037_s0 + $0xc] sm:$0xf] }
   0x2   :  { %v43_v1 = vld [vmem:[%s1037_s0] sm:$0xf]  ;;  %v522_v4 = vld [vmem:[%s1037_s0 + $0x4] sm:$0xf]  ;;  %81 = vperm.xlu2 %561, %v53_v0   ;;  %67 = vperm.xlu1 %559, %v53_v0   ;;  %v51_v8 = vmax.f32 %v523_v5, %v524_v6 }
   0x3   :  { %v46_v7 = vmax.f32 %v43_v1, %v522_v4 }
   0x4   :  { %17 = vsyncpa [#allocation3], 0  ;;  %v641_v10 = vmov 0   ;;  %s642_s30 = smov 8   ;;  %v643_v11 = vmov 1   ;;  %v644_v12 = vmov 6  }
   0x5   :  { %v754_v9 = vmax.f32 %v46_v7, %v51_v8  ;;  %558 = vset.pattern.permute.xlu0 %v641_v10  ;;  %v645_v13 = vmov 7   ;;  %v646_v14 = vmov 4   ;;  %v647_v15 = vmov 10   ;;  %s649_s0 = smov 120   ;;  %v772_v20 = vld [vmem:[%s1041_s4] sm:$0xff]  ;;  %s666_s21 = smov 9  }
   0x6   :  { %v648_v16 = vmov 2   ;;  %v650_v17 = vmov 5   ;;  %v651_v18 = vmov 11   ;;  %v652_v19 = vmov 8   ;;  %v147_v22 = vld [vmem:[%s1040_s3] sm:$0xff]  ;;  %s667_s22 = smov 127  }
   0x7   :  { %54 = vrot.lane.b32.xlu0 %v754_v9, %s642_s30  ;;  %v653_v21 = vmov 21   ;;  %v654_v23 = vmov 13   ;;  %v655_v24 = vmov 12   ;;  %v656_v25 = vmov 18   ;;  %v806_v32 = vld [vmem:[%s1038_s1] sm:$0xf] }
   0x8   :  { %v657_v26 = vmov 15   ;;  %v658_v27 = vmov 19   ;;  %v659_v28 = vmov 16   ;;  %v660_v30 = vmov 22   ;;  %v812_v33 = vld [vmem:[%s1043_s6] sm:$0xf] }
   0x9   :  { %v661_v31 = vmov 17   ;;  %v817_v36 = vperm.slane %v806_v32, 0  ;;  %v662_v37 = vmov 14   ;;  %v663_v44 = vmov 23   ;;  %v332_v6 = vld [vmem:[%s1042_s5] sm:$0xff]  ;;  %s668_s23 = smov 7  }
   0xa   :  { %562 = vset.pattern.permute.xlu2 %v643_v11  ;;  %560 = vset.pattern.permute.xlu1 %v644_v12  ;;  %v827_v48 = vperm.slane %v754_v9, 0  ;;  %v830_v54 = vperm.slane %v754_v9, 1  ;;  %v834_v56 = vperm.slane %v754_v9, 2  ;;  %v664_v58 = vmov 20   ;;  %s513_s13 = sshll.u32 %s1049_s12, 4  ;;  %s514_s13 = int_to_ptr.hbm [resolvable:$true] %s513_s13 }
   0xb   :  { %88 = vperm.xlu2 %562, %v53_v0   ;;  %74 = vperm.xlu1 %560, %v53_v0   ;;  %v845_v4 = vperm.slane %v806_v32, 1  ;;  %vm468_vm0 = vcmask 1043456  }
   0xf   :  { %60 = vperm.xlu0 %558, %v53_v0  }
  0x13   :  { %564 = vset.pattern.permute.xlu2 %v645_v13  ;;  %563 = vset.pattern.permute.xlu1 %v646_v14 }
  0x14   :  { %102 = vperm.xlu2 %564, %v53_v0   ;;  %95 = vperm.xlu1 %563, %v53_v0  }
  0x17   :  { %565 = vset.pattern.permute.xlu0 %v647_v15 }
  0x18   :  { %109 = vperm.xlu0 %565, %v53_v0  }
  0x1c   :  { %566 = vset.pattern.permute.xlu2 %v648_v16  ;;  %115 = vrot.lane.b32.xlu1 %v754_v9, %s649_s0 }
  0x1d   :  { %120 = vperm.xlu2 %566, %v53_v0   ;;  %567 = vset.pattern.permute.xlu1 %v650_v17 }
  0x20   :  { %569 = vset.pattern.permute.xlu0 %v651_v18 }
  0x21   :  { %141 = vperm.xlu0 %569, %v53_v0  }
  0x24   :  { %127 = vperm.xlu1 %567, %v53_v0  }
  0x25   :  { %568 = vset.pattern.permute.xlu2 %v652_v19 }
  0x26   :  { %134 = vperm.xlu2 %568, %v53_v0  }
  0x29   :  { %576 = vset.pattern.permute.xlu0 %v653_v21 }
  0x2a   :  { %210 = vperm.xlu0 %576, %v772_v20  }
  0x2c   :  { %570 = vset.pattern.permute.xlu1 %v641_v10 }
  0x2d   :  { %150 = vperm.xlu1 %570, %v147_v22  }
  0x2e   :  { %571 = vset.pattern.permute.xlu2 %v640_v3 }
  0x2f   :  { %168 = vperm.xlu2 %571, %v772_v20  }
  0x32   :  { %581 = vset.pattern.permute.xlu0 %v654_v23 }
  0x33   :  { %245 = vperm.xlu0 %581, %v772_v20  }
  0x35   :  { %161 = vperm.xlu1 %570, %v772_v20  }
  0x37   :  { %573 = vset.pattern.permute.xlu2 %v655_v24 }
  0x38   :  { %189 = vperm.xlu2 %573, %v772_v20  }
  0x3b   :  { %585 = vset.pattern.permute.xlu0 %v648_v16 }
  0x3c   :  { %277 = vperm.xlu0 %585, %v772_v20  }
  0x3d   :  { %572 = vset.pattern.permute.xlu1 %v639_v2  ;;  %v842_v2 = vperm.slane %v754_v9, 3 }
  0x3e   :  { %182 = vperm.xlu1 %572, %v772_v20  }
  0x40   :  { %575 = vset.pattern.permute.xlu2 %v656_v25 }
  0x41   :  { %203 = vperm.xlu2 %575, %v772_v20  }
  0x44   :  { %590 = vset.pattern.permute.xlu0 %v661_v31 }
  0x45   :  { %312 = vperm.xlu0 %590, %v772_v20  }
  0x46   :  { %574 = vset.pattern.permute.xlu1 %v657_v26 }
  0x47   :  { %196 = vperm.xlu1 %574, %v772_v20  }
  0x49   :  { %578 = vset.pattern.permute.xlu2 %v646_v14 }
  0x4a   :  { %224 = vperm.xlu2 %578, %v772_v20  }
  0x4d   :  { %595 = vset.pattern.permute.xlu0 %v643_v11 }
  0x4e   :  { %348 = vperm.xlu0 %595, %v812_v33  }
  0x4f   :  { %577 = vset.pattern.permute.xlu1 %v643_v11 }
  0x50   :  { %217 = vperm.xlu1 %577, %v772_v20  }
  0x52   :  { %580 = vset.pattern.permute.xlu2 %v647_v15 }
  0x53   :  { %238 = vperm.xlu2 %580, %v772_v20  }
  0x56   :  { %599 = vset.pattern.permute.xlu0 %v641_v10 }
  0x58   :  { %579 = vset.pattern.permute.xlu1 %v645_v13 }
  0x59   :  { %231 = vperm.xlu1 %579, %v772_v20  }
  0x5b   :  { %583 = vset.pattern.permute.xlu2 %v658_v27 }
  0x5c   :  { %259 = vperm.xlu2 %583, %v772_v20   ;;  %v82_v29 = vpop.permute.xlu2 %81 }
  0x61   :  { %582 = vset.pattern.permute.xlu1 %v659_v28 }
  0x62   :  { %252 = vperm.xlu1 %582, %v772_v20  }
  0x64   :  { %587 = vset.pattern.permute.xlu2 %v652_v19 }
  0x65   :  { %291 = vperm.xlu2 %587, %v772_v20   ;;  %v89_v34 = vpop.permute.xlu2 %88 }
  0x66   :  { %v92_v55 = vmul.f32 %v827_v48, %v89_v34 }
  0x6a   :  { %584 = vset.pattern.permute.xlu1 %v660_v30 }
  0x6b   :  { %266 = vperm.xlu1 %584, %v772_v20  }
  0x6d   :  { %589 = vset.pattern.permute.xlu2 %v662_v37 }
  0x6e   :  { %305 = vperm.xlu2 %589, %v772_v20   ;;  %v103_v43 = vpop.permute.xlu2 %102 }
  0x6f   :  { %v106_v63 = vmul.f32 %v834_v56, %v103_v43 }
  0x73   :  { %586 = vset.pattern.permute.xlu1 %v650_v17 }
  0x74   :  { %v68_v35 = vpop.permute.xlu1 %67  ;;  %284 = vperm.xlu1 %586, %v772_v20  }
  0x76   :  { %592 = vset.pattern.permute.xlu2 %v663_v44 }
  0x77   :  { %326 = vperm.xlu2 %592, %v772_v20   ;;  %v121_v62 = vpop.permute.xlu2 %120 }
  0x79   :  { %v55_v38 = vpop.permute.xlu0 %54 }
  0x7a   :  { %v57_v39 = vmul.f32 %v817_v36, %v55_v38 }
  0x7c   :  { %588 = vset.pattern.permute.xlu1 %v651_v18  ;;  %v63_v41 = vperm.slane %v57_v39, 0  ;;  %v70_v42 = vperm.slane %v57_v39, 1  ;;  %v84_v45 = vperm.slane %v57_v39, 3  ;;  %v77_v46 = vperm.slane %v57_v39, 2  ;;  %v365_v39 = vld [vmem:[%s1044_s7] sm:$0xf] }
  0x7d   :  { %v75_v40 = vpop.permute.xlu1 %74  ;;  %298 = vperm.xlu1 %588, %v772_v20  }
  0x7e   :  { %v71_v50 = vmul.f32 %v70_v42, %v68_v35  ;;  %v78_v51 = vmul.f32 %v77_v46, %v75_v40  ;;  %v85_v53 = vmul.f32 %v84_v45, %v82_v29 }
  0x7f   :  { %594 = vset.pattern.permute.xlu2 %v641_v10 }
  0x80   :  { %342 = vperm.xlu2 %594, %v812_v33   ;;  %v135_v22 = vpop.permute.xlu2 %134 }
  0x81   :  { %v61_v47 = vpop.permute.xlu0 %60 }
  0x82   :  { %v64_v49 = vmul.f32 %v63_v41, %v61_v47 }
  0x84   :  { %v72_v52 = vadd.f32 %v71_v50, %v64_v49 }
  0x85   :  { %591 = vset.pattern.permute.xlu1 %v664_v58  ;;  %v896_v58 = vld [vmem:[%s1045_s8] sm:$0xf]  ;;  %s665_s8 = smov 1  }
  0x86   :  { %v79_v57 = vadd.f32 %v78_v51, %v72_v52  ;;  %v96_v59 = vpop.permute.xlu1 %95  ;;  %319 = vperm.xlu1 %591, %v772_v20   ;;  %380 = vperm.xlu0 %599, %v896_v58  }
  0x87   :  { %v99_v61 = vmul.f32 %v830_v54, %v96_v59 }
  0x88   :  { %v86_v60 = vadd.f32 %v85_v53, %v79_v57  ;;  %597 = vset.pattern.permute.xlu2 %v640_v3 }
  0x89   :  { %360 = vperm.xlu2 %597, %v812_v33   ;;  %v866_v43 = vpop.permute.xlu2 %168 }
  0x8a   :  { %v93_v0 = vadd.f32 %v92_v55, %v86_v60  ;;  %v110_v5 = vpop.permute.xlu0 %109 }
  0x8b   :  { %v113_v15 = vmul.f32 %v842_v2, %v110_v5 }
  0x8c   :  { %v100_v1 = vadd.f32 %v99_v61, %v93_v0 }
  0x8e   :  { %v107_v7 = vadd.f32 %v106_v63, %v100_v1  ;;  %593 = vset.pattern.permute.xlu1 %v641_v10  ;;  %v116_v8 = vpop.permute.xlu1 %115  ;;  %600 = vset.pattern.permute.xlu0 %v644_v12 }
  0x8f   :  { %v118_v18 = vmul.f32 %v845_v4, %v116_v8  ;;  %335 = vperm.xlu1 %593, %v332_v6   ;;  %175 = vperm.xlu0 %600, %v772_v20  }
  0x90   :  { %v114_v23 = vadd.f32 %v113_v15, %v107_v7 }
  0x91   :  { %v123_v9 = vperm.slane %v118_v18, 0  ;;  %v137_v21 = vperm.slane %v118_v18, 2  ;;  %v130_v27 = vperm.slane %v118_v18, 1  ;;  %v144_v29 = vperm.slane %v118_v18, 3  ;;  %601 = vset.pattern.permute.xlu2 %v643_v11 }
  0x92   :  { %v871_v44 = vpop.permute.xlu2 %189 }
  0x93   :  { %v124_v24 = vmul.f32 %v123_v9, %v121_v62  ;;  %v138_v25 = vmul.f32 %v137_v21, %v135_v22  ;;  %v142_v31 = vpop.permute.xlu0 %141 }
  0x94   :  { %v145_v35 = vmul.f32 %v144_v29, %v142_v31  ;;  %v470_v29 = vld [vmem:[%s1047_s10] sm:$0xff]  ;;  %s669_s10 = smov 121  }
  0x95   :  { %v125_v26 = vadd.f32 %v124_v24, %v114_v23 }
  0x96   :  { %v128_v28 = vpop.permute.xlu1 %127 }
  0x97   :  { %v131_v30 = vmul.f32 %v130_v27, %v128_v28  ;;  %596 = vset.pattern.permute.xlu1 %v648_v16 }
  0x98   :  { %354 = vperm.xlu1 %596, %v812_v33  }
  0x99   :  { %v132_v34 = vadd.f32 %v131_v30, %v125_v26  ;;  %v496_v30 = vld [vmem:[%s1048_s11] sm:$0xff]  ;;  %s670_s11 = smov 119  }
  0x9b   :  { %v139_v37 = vadd.f32 %v138_v25, %v132_v34  ;;  %v875_v46 = vpop.permute.xlu2 %203 }
  0x9c   :  { %v891_v57 = vpop.permute.xlu0 %210 }
  0x9d   :  { %v146_v38 = vadd.f32 %v145_v35, %v139_v37 }
  0x9f   :  { %v151_v40 = vpop.permute.xlu1 %150 }
  0xa0   :  { %v861_v41 = vadd.f32 %v151_v40, %v146_v38  ;;  %598 = vset.pattern.permute.xlu1 %v641_v10 }
  0xa1   :  { %368 = vperm.xlu1 %598, %v365_v39  }
  0xa4   :  { %v879_v49 = vpop.permute.xlu2 %224 }
  0xa5   :  { %v903_v61 = vpop.permute.xlu0 %245 }
  0xa7   :  { %v864_v42 = vpop.permute.xlu1 %161 }
  0xa9   :  { %603 = vset.pattern.permute.xlu1 %v640_v3 }
  0xad   :  { %v883_v51 = vpop.permute.xlu2 %238 }
  0xae   :  { %v911_v0 = vpop.permute.xlu0 %277 }
  0xb0   :  { %v869_v33 = vpop.permute.xlu1 %182 }
  0xb6   :  { %v887_v53 = vpop.permute.xlu2 %259 }
  0xb7   :  { %v917_v6 = vpop.permute.xlu0 %312 }
  0xb9   :  { %v873_v45 = vpop.permute.xlu1 %196 }
  0xbf   :  { %v899_v59 = vpop.permute.xlu2 %291 }
  0xc0   :  { %v349_v15 = vpop.permute.xlu0 %348 }
  0xc1   :  { %v351_v20 = vmul.f32 %v349_v15, %v830_v54 }
  0xc2   :  { %v877_v47 = vpop.permute.xlu1 %217 }
  0xc8   :  { %v907_v62 = vpop.permute.xlu2 %305 }
  0xcb   :  { %v881_v50 = vpop.permute.xlu1 %231 }
  0xd1   :  { %v913_v1 = vpop.permute.xlu2 %326 }
  0xd4   :  { %v885_v52 = vpop.permute.xlu1 %252 }
  0xda   :  { %v343_v8 = vpop.permute.xlu2 %342 }
  0xdb   :  { %v345_v12 = vmul.f32 %v343_v8, %v827_v48 }
  0xdd   :  { %v889_v55 = vpop.permute.xlu1 %266  ;;  %v352_v22 = vadd.f32 %v351_v20, %v345_v12 }
  0xe3   :  { %v361_v21 = vpop.permute.xlu2 %360 }
  0xe4   :  { %v363_v24 = vmul.f32 %v361_v21, %v842_v2 }
  0xe6   :  { %v901_v60 = vpop.permute.xlu1 %284 }
  0xef   :  { %v909_v63 = vpop.permute.xlu1 %298 }
  0xf8   :  { %v915_v5 = vpop.permute.xlu1 %319 }
 0x101   :  { %v919_v7 = vpop.permute.xlu1 %335 }
 0x10a   :  { %v355_v18 = vpop.permute.xlu1 %354 }
 0x10b   :  { %v357_v9 = vmul.f32 %v355_v18, %v834_v56 }
 0x10d   :  { %v358_v23 = vadd.f32 %v357_v9, %v352_v22 }
 0x10f   :  { %v364_v25 = vadd.f32 %v363_v24, %v358_v23 }
 0x113   :  { %v369_v26 = vpop.permute.xlu1 %368 }
 0x114   :  { %v371_v27 = vadd.f32 %v369_v26, %v364_v25 }
 0x116   :  { %v925_v28 = vmax.f32 %v371_v27, 0.0  ;;  %v227_v27 = vperm.slane %v861_v41, 1 }
 0x118   :  { %404 = vrot.lane.b32.xlu0 %v925_v28, %s665_s8  ;;  %385 = vrot.lane.b32.xlu1 %v925_v28, %s642_s30 }
 0x119   :  { %374 = vrot.lane.b32.xlu2 %v925_v28, %s666_s21 }
 0x120   :  { %419 = vrot.lane.b32.xlu0 %v925_v28, %s667_s22  ;;  %394 = vrot.lane.b32.xlu1 %v925_v28, %s668_s23 }
 0x121   :  { %155 = vrot.lane.b32.xlu2 %v861_v41, %s665_s8 }
 0x128   :  { %408 = vperm.xlu1 %603, %v896_v58   ;;  %433 = vperm.xlu0 %600, %v896_v58  }
 0x129   :  { %272 = vrot.lane.b32.xlu2 %v861_v41, %s667_s22 }
 0x130   :  { %605 = vset.pattern.permute.xlu1 %v650_v17  ;;  %608 = vset.pattern.permute.xlu0 %v641_v10 }
 0x131   :  { %389 = vperm.xlu2 %601, %v896_v58   ;;  %423 = vperm.xlu1 %605, %v896_v58  }
 0x132   :  { %473 = vperm.xlu0 %608, %v470_v29  }
 0x139   :  { %602 = vset.pattern.permute.xlu2 %v648_v16  ;;  %438 = vrot.lane.b32.xlu1 %v925_v28, %s649_s0 }
 0x13a   :  { %399 = vperm.xlu2 %602, %v896_v58   ;;  %606 = vset.pattern.permute.xlu1 %v645_v13  ;;  %v457_v13 = vld [vmem:[%s1046_s9] sm:$0xf]  ;;  %s671_s9 = smov [#allocation2]  }
 0x13b   :  { %499 = vperm.xlu0 %608, %v496_v30   ;;  %s511_s2 = sshll.u32 %s671_s9, 4  ;;  %s512_s2 = int_to_ptr.vmem [resolvable:$true] %s511_s2 }
 0x141   :  { %442 = vperm.xlu1 %606, %v896_v58  }
 0x142   :  { %604 = vset.pattern.permute.xlu2 %v646_v14  ;;  %v968_v14 = vpop.permute.xlu0 %380 }
 0x143   :  { %414 = vperm.xlu2 %604, %v896_v58  }
 0x149   :  { %609 = vset.pattern.permute.xlu1 %v643_v11 }
 0x14a   :  { %479 = vperm.xlu1 %609, %v470_v29   ;;  %v176_v37 = vpop.permute.xlu0 %175 }
 0x14b   :  { %428 = vrot.lane.b32.xlu2 %v925_v28, %s669_s10 }
 0x14c   :  { %607 = vset.pattern.permute.xlu2 %v652_v19 }
 0x152   :  { %611 = vset.pattern.permute.xlu1 %v648_v16  ;;  %v971_v16 = vperm.slane %v806_v32, 2 }
 0x153   :  { %447 = vrot.lane.b32.xlu2 %v925_v28, %s670_s11  ;;  %485 = vperm.xlu1 %611, %v470_v29  }
 0x15b   :  { %452 = vperm.xlu2 %607, %v896_v58  }
 0x163   :  { %610 = vset.pattern.permute.xlu2 %v641_v10 }
 0x164   :  { %460 = vperm.xlu2 %610, %v457_v13  }
 0x16c   :  { %612 = vset.pattern.permute.xlu2 %v640_v3 }
 0x16d   :  { %491 = vperm.xlu2 %612, %v470_v29   ;;  %v220_v29 = vperm.slane %v861_v41, 0 }
 0x16f   :  { %v221_v13 = vmul.f32 %v220_v29, %v877_v47 }
 0x173   :  { %v966_v11 = vpop.permute.xlu2 %374 }
 0x17b   :  { %v156_v17 = vpop.permute.xlu2 %155 }
 0x17c   :  { %v158_v19 = vmul.f32 %v971_v16, %v156_v17  ;;  %v228_v17 = vmul.f32 %v227_v27, %v879_v49 }
 0x17e   :  { %v164_v31 = vperm.slane %v158_v19, 0  ;;  %v171_v34 = vperm.slane %v158_v19, 1  ;;  %v178_v35 = vperm.slane %v158_v19, 2  ;;  %v185_v3 = vperm.slane %v158_v19, 3 }
 0x17f   :  { %v192_v58 = vperm.slane %v158_v19, 4  ;;  %v199_v20 = vperm.slane %v158_v19, 5  ;;  %v206_v21 = vperm.slane %v158_v19, 6  ;;  %v213_v24 = vperm.slane %v158_v19, 7 }
 0x180   :  { %v165_v10 = vmul.f32 %v164_v31, %v864_v42  ;;  %v172_v38 = vmul.f32 %v171_v34, %v866_v43  ;;  %v179_v40 = vmul.f32 %v178_v35, %v176_v37  ;;  %v186_v12 = vmul.f32 %v185_v3, %v869_v33 }
 0x181   :  { %v193_v9 = vmul.f32 %v192_v58, %v871_v44  ;;  %v200_v23 = vmul.f32 %v199_v20, %v873_v45  ;;  %v207_v43 = vmul.f32 %v206_v21, %v875_v46  ;;  %v214_v33 = vmul.f32 %v213_v24, %v891_v57 }
 0x182   :  { %v173_v39 = vadd.f32 %v172_v38, %v165_v10  ;;  %v234_v45 = vperm.slane %v861_v41, 2  ;;  %v248_v31 = vperm.slane %v861_v41, 4  ;;  %v241_v46 = vperm.slane %v861_v41, 3 }
 0x183   :  { %v273_v8 = vpop.permute.xlu2 %272  ;;  %v255_v3 = vperm.slane %v861_v41, 5 }
 0x184   :  { %v180_v15 = vadd.f32 %v179_v40, %v173_v39  ;;  %v235_v34 = vmul.f32 %v234_v45, %v881_v50  ;;  %v242_v10 = vmul.f32 %v241_v46, %v883_v51  ;;  %v249_v47 = vmul.f32 %v248_v31, %v903_v61 }
 0x185   :  { %v262_v39 = vperm.slane %v861_v41, 6  ;;  %v256_v40 = vmul.f32 %v255_v3, %v885_v52  ;;  %v269_v50 = vperm.slane %v861_v41, 7  ;;  %v376_v52 = vmul.f32 %v966_v11, %v817_v36 }
 0x186   :  { %v187_v18 = vadd.f32 %v186_v12, %v180_v15 }
 0x187   :  { %v263_v15 = vmul.f32 %v262_v39, %v887_v53  ;;  %v270_v51 = vmul.f32 %v269_v50, %v889_v55  ;;  %v377_v55 = vmul.f32 %v376_v52, %v971_v16 }
 0x188   :  { %v194_v22 = vadd.f32 %v193_v9, %v187_v18  ;;  %v274_v9 = vperm.slane %v806_v32, 3 }
 0x18a   :  { %v201_v42 = vadd.f32 %v200_v23, %v194_v22  ;;  %v386_v25 = vpop.permute.xlu1 %385  ;;  %v405_v21 = vpop.permute.xlu0 %404  ;;  %v998_v23 = vmul.f32 %v274_v9, %v273_v8 }
 0x18b   :  { %v390_v26 = vpop.permute.xlu2 %389  ;;  %v387_v53 = vmul.f32 %v386_v25, %v817_v36  ;;  %v406_v11 = vmul.f32 %v405_v21, %v971_v16 }
 0x18c   :  { %v208_v30 = vadd.f32 %v207_v43, %v201_v42  ;;  %v280_v42 = vperm.slane %v998_v23, 0  ;;  %v287_v8 = vperm.slane %v998_v23, 1  ;;  %v308_v50 = vperm.slane %v998_v23, 4 }
 0x18d   :  { %v392_v32 = vmul.f32 %v390_v26, %v387_v53  ;;  %v294_v26 = vperm.slane %v998_v23, 2  ;;  %v315_v21 = vperm.slane %v998_v23, 5 }
 0x18e   :  { %v215_v44 = vadd.f32 %v214_v33, %v208_v30  ;;  %v281_v30 = vmul.f32 %v280_v42, %v911_v0  ;;  %v383_v33 = vmul.f32 %v968_v14, %v377_v55 }
 0x190   :  { %v222_v19 = vadd.f32 %v221_v13, %v215_v44 }
 0x192   :  { %v229_v35 = vadd.f32 %v228_v17, %v222_v19  ;;  %v395_v37 = vpop.permute.xlu1 %394  ;;  %v420_v29 = vpop.permute.xlu0 %419  ;;  %v288_v19 = vmul.f32 %v287_v8, %v901_v60 }
 0x193   :  { %v396_v24 = vmul.f32 %v395_v37, %v817_v36  ;;  %v393_v36 = vadd.f32 %v392_v32, %v383_v33 }
 0x194   :  { %v236_v38 = vadd.f32 %v235_v34, %v229_v35  ;;  %v400_v57 = vpop.permute.xlu2 %399  ;;  %v421_v34 = vmul.f32 %v420_v29, %v274_v9 }
 0x195   :  { %v397_v43 = vmul.f32 %v396_v24, %v274_v9 }
 0x196   :  { %v243_v49 = vadd.f32 %v242_v10, %v236_v38  ;;  %v295_v10 = vmul.f32 %v294_v26, %v899_v59  ;;  %v301_v38 = vperm.slane %v998_v23, 3 }
 0x197   :  { %v402_v13 = vmul.f32 %v400_v57, %v397_v43 }
 0x198   :  { %v250_v58 = vadd.f32 %v249_v47, %v243_v49 }
 0x199   :  { %v403_v31 = vadd.f32 %v402_v13, %v393_v36 }
 0x19a   :  { %v257_v12 = vadd.f32 %v256_v40, %v250_v58  ;;  %v409_v20 = vpop.permute.xlu1 %408  ;;  %v434_v47 = vpop.permute.xlu0 %433 }
 0x19b   :  { %v411_v25 = vmul.f32 %v409_v20, %v406_v11 }
 0x19c   :  { %v264_v18 = vadd.f32 %v263_v15, %v257_v12  ;;  %v302_v15 = vmul.f32 %v301_v38, %v909_v63  ;;  %v322_v63 = vperm.slane %v998_v23, 6 }
 0x19d   :  { %v415_v61 = vpop.permute.xlu2 %414  ;;  %v412_v35 = vadd.f32 %v411_v25, %v403_v31 }
 0x19e   :  { %v271_v22 = vadd.f32 %v270_v51, %v264_v18  ;;  %v417_v14 = vmul.f32 %v415_v61, %v925_v28  ;;  %v309_v61 = vmul.f32 %v308_v50, %v907_v62  ;;  %v323_v32 = vmul.f32 %v322_v63, %v915_v5 }
 0x1a0   :  { %v282_v44 = vadd.f32 %v281_v30, %v271_v22  ;;  %v418_v49 = vadd.f32 %v417_v14, %v412_v35 }
 0x1a2   :  { %v289_v0 = vadd.f32 %v288_v19, %v282_v44 }
 0x1a3   :  { %v424_v41 = vpop.permute.xlu1 %423 }
 0x1a4   :  { %v426_v57 = vmul.f32 %v424_v41, %v421_v34  ;;  %v296_v3 = vadd.f32 %v295_v10, %v289_v0  ;;  %v474_v43 = vpop.permute.xlu0 %473 }
 0x1a5   :  { %v429_v27 = vpop.permute.xlu2 %428  ;;  %v476_v29 = vmul.f32 %v474_v43, %v827_v48 }
 0x1a6   :  { %v430_v17 = vmul.f32 %v429_v27, %v845_v4  ;;  %v427_v12 = vadd.f32 %v426_v57, %v418_v49  ;;  %v303_v59 = vadd.f32 %v302_v15, %v296_v3 }
 0x1a8   :  { %v431_v37 = vmul.f32 %v430_v17, %v971_v16  ;;  %v310_v24 = vadd.f32 %v309_v61, %v303_v59 }
 0x1aa   :  { %v436_v60 = vmul.f32 %v434_v47, %v431_v37 }
 0x1ab   :  { %v439_v45 = vpop.permute.xlu1 %438 }
 0x1ac   :  { %v440_v39 = vmul.f32 %v439_v45, %v845_v4  ;;  %v437_v51 = vadd.f32 %v436_v60, %v427_v12 }
 0x1ad   :  { %v448_v46 = vpop.permute.xlu2 %447 }
 0x1ae   :  { %v449_v40 = vmul.f32 %v448_v46, %v845_v4  ;;  %v316_v4 = vmul.f32 %v315_v21, %v917_v6 }
 0x1b0   :  { %v450_v18 = vmul.f32 %v449_v40, %v274_v9  ;;  %v317_v55 = vadd.f32 %v316_v4, %v310_v24  ;;  %v329_v9 = vperm.slane %v998_v23, 7 }
 0x1b2   :  { %v324_v8 = vadd.f32 %v323_v32, %v317_v55  ;;  %v330_v33 = vmul.f32 %v329_v9, %v913_v1 }
 0x1b3   :  { %v443_v58 = vpop.permute.xlu1 %442 }
 0x1b4   :  { %v445_v16 = vmul.f32 %v443_v58, %v440_v39  ;;  %v331_v36 = vadd.f32 %v330_v33, %v324_v8 }
 0x1b5   :  { %v453_v20 = vpop.permute.xlu2 %452 }
 0x1b6   :  { %v446_v22 = vadd.f32 %v445_v16, %v437_v51  ;;  %v455_v52 = vmul.f32 %v453_v20, %v450_v18  ;;  %v338_v48 = vadd.f32 %v919_v7, %v331_v36 }
 0x1b8   :  { %v456_v41 = vadd.f32 %v455_v52, %v446_v22 }
 0x1bc   :  { %v480_v53 = vpop.permute.xlu1 %479 }
 0x1bd   :  { %v482_v30 = vmul.f32 %v480_v53, %v830_v54  ;;  %v500_v54 = vpop.permute.xlu0 %499 }
 0x1be   :  { %v461_v42 = vpop.permute.xlu2 %460 }
 0x1bf   :  { %v463_v27 = vadd.f32 %v461_v42, %v456_v41  ;;  %v483_v13 = vadd.f32 %v482_v30, %v476_v29 }
 0x1c1   :  { %v464_v62 = vmax.f32 %v463_v27, 0.0 }
 0x1c3   :  { %v466_v6 = vrot.slane %v464_v62, 4 }
 0x1c5   :  { %v486_v11 = vpop.permute.xlu1 %485  ;;  %v469_v23 = vsel %vm468_vm0, %v925_v28, %v466_v6 }
 0x1c6   :  { %v488_v44 = vmul.f32 %v486_v11, %v834_v56  ;;  %v503_v19 = vadd.f32 %v469_v23, %v338_v48 }
 0x1c7   :  { %v492_v25 = vpop.permute.xlu2 %491 }
 0x1c8   :  { %v489_v17 = vadd.f32 %v488_v44, %v483_v13  ;;  %v494_v5 = vmul.f32 %v492_v25, %v842_v2 }
 0x1ca   :  { %v495_v45 = vadd.f32 %v494_v5, %v489_v17 }
 0x1cc   :  { %v502_v1 = vadd.f32 %v500_v54, %v495_v45 }
 0x1ce   :  { %v504_v56 = vadd.f32 %v503_v19, %v502_v1 }
 0x1d0   :  { %505 = vst [vmem:[#allocation2] sm:$0xff] %v504_v56 }
 0x1d1   :  { %516 = dma.vmem_to_hbm [thread:$0]  %s512_s2, 128, %s514_s13, [#allocation3]  }
 0x1d2   :  { %637 = dma.done.wait [#allocation3], 128  }
 0x1d3   :  { %638 = vsyncadd [#allocation3], 4294967168 }
 0x1d4   :  { %521 = vsyncpa [#allocation3], 1 }

</bundles_post_ra>
